<compile_context>
chip_gen: v7x
topology: tpu7x:2x2x1
jax: 0.10.0
libtpu: 0.0.40
codegen_flags: <defaults>
</compile_context>

<pallas_src>
import jax
import jax.numpy as jnp
from jax import lax
from jax.experimental import pallas as pl
from jax.experimental.pallas import tpu as pltpu

# ----------------------------- config ---------------------------------------
config = dict(
    hidden_size=128,
    num_attention_heads=4,
    num_key_value_heads=2,
    head_dim=32,
    intermediate_size=256,
    rms_norm_eps=1e-6,
    attention_bias=False,
    mlp_bias=False,
    attention_dropout=0.0,
)

HIDDEN = config["hidden_size"]
N_HEADS = config["num_attention_heads"]
N_KV = config["num_key_value_heads"]
HEAD_DIM = config["head_dim"]
INTER = config["intermediate_size"]
EPS = config["rms_norm_eps"]
GROUPS = N_HEADS // N_KV
SCALING = HEAD_DIM ** (-0.5)

SEQ = 8
BATCH = 1  # max_bs = 1 in the PyTorch module

Q_DIM = N_HEADS * HEAD_DIM          # 128
KV_DIM = N_KV * HEAD_DIM            # 64
QKV_DIM = Q_DIM + 2 * KV_DIM        # 256 (fused q|k|v projection width)
NEG_INF = -1e30                     # finite mask value (robust vs -inf)


# --------------------------- kernel helpers ----------------------------------
def _rmsnorm(x, w):
    # x: (S, H) f32, w: (1, H) f32
    var = jnp.mean(x * x, axis=-1, keepdims=True)
    return (x * lax.rsqrt(var + EPS)) * w


# ------------------------------ kernel ---------------------------------------
def decoder_stack_kernel(x_ref, cosb_ref, sinl_ref, sinr_ref,
                         w_in_ref, wqkv_ref, wo_ref,
                         w_post_ref, wgu_ref, wd_ref,
                         out_ref):
    layer = pl.program_id(0)

    # The output block index is constant over the layer grid axis, so the
    # block stays resident in VMEM and carries the hidden state across layers.
    @pl.when(layer == 0)
    def _():
        out_ref[...] = x_ref[...]

    x = out_ref[...]                                   # (S, H) f32 hidden state

    # ---- input RMSNorm ----
    xn = _rmsnorm(x, w_in_ref[...])

    # ---- fused q|k|v projection (bf16 weights, f32 activations/accumulate) ----
    qkv = jnp.dot(xn, wqkv_ref[...], preferred_element_type=jnp.float32)  # (S, 256)

    # ---- RoPE on the whole q|k slab (v columns pass through unchanged) ----
    # rotate_half within each 32-wide head block is expressed as two global
    # lane rotations of the (S, 256) slab; the host-built signed-sin tables
    # select the correct rotation per column, are zero on the v columns, and
    # already fold in head_dim**-0.5 on the q columns.
    half = HEAD_DIM // 2
    left = jnp.concatenate([qkv[:, half:], qkv[:, :half]], axis=1)            # x[p + half]
    right = jnp.concatenate([qkv[:, QKV_DIM - half:], qkv[:, :QKV_DIM - half]],
                            axis=1)                                           # x[p - half]
    qkv = qkv * cosb_ref[...] + left * sinl_ref[...] + right * sinr_ref[...]

    q = qkv[:, :Q_DIM]                       # (S, 128), pre-scaled
    k = qkv[:, Q_DIM:Q_DIM + KV_DIM]         # (S, 64)
    v = qkv[:, Q_DIM + KV_DIM:]              # (S, 64)

    # ---- causal GQA attention, grouped per KV head ----
    row = lax.broadcasted_iota(jnp.int32, (GROUPS * SEQ, SEQ), 0)
    col = lax.broadcasted_iota(jnp.int32, (GROUPS * SEQ, SEQ), 1)
    causal = (row % SEQ) >= col              # (GROUPS*S, S)

    head_outs = []
    for kv in range(N_KV):
        kg = k[:, kv * HEAD_DIM:(kv + 1) * HEAD_DIM]      # (S, hd)
        vg = v[:, kv * HEAD_DIM:(kv + 1) * HEAD_DIM]      # (S, hd)
        # stack the GROUPS query heads that share this KV head along rows
        qg = jnp.concatenate(
            [q[:, (kv * GROUPS + i) * HEAD_DIM:(kv * GROUPS + i + 1) * HEAD_DIM]
             for i in range(GROUPS)], axis=0)             # (GROUPS*S, hd)
        s = jnp.dot(qg, kg.T, preferred_element_type=jnp.float32)   # (GROUPS*S, S)
        s = jnp.where(causal, s, NEG_INF)
        m = jnp.max(s, axis=-1, keepdims=True)
        p = jnp.exp(s - m)
        p = p * pl.reciprocal(jnp.sum(p, axis=-1, keepdims=True), approx=True)
        og = jnp.dot(p, vg, preferred_element_type=jnp.float32)     # (GROUPS*S, hd)
        head_outs.extend([og[i * SEQ:(i + 1) * SEQ] for i in range(GROUPS)])
    attn = jnp.concatenate(head_outs, axis=-1)            # (S, n_heads*hd)

    attn_out = jnp.dot(attn, wo_ref[...], preferred_element_type=jnp.float32)

    # ---- residual + post-attn RMSNorm + SwiGLU MLP + residual ----
    h1 = x + attn_out
    hn = _rmsnorm(h1, w_post_ref[...])
    gu = jnp.dot(hn, wgu_ref[...], preferred_element_type=jnp.float32)   # (S, 2*INTER)
    g_ = gu[:, :INTER]
    u_ = gu[:, INTER:]
    act = g_ * pl.reciprocal(1.0 + jnp.exp(-g_), approx=True)            # SiLU
    mlp = jnp.dot(act * u_, wd_ref[...], preferred_element_type=jnp.float32)

    out_ref[...] = h1 + mlp


# ------------------------------ wrapper --------------------------------------
def _rope_tables(cos, sin):
    """Broadcast cos / sin over the fused q|k|v columns.

    cosb : per-column cos (q columns pre-scaled by head_dim**-0.5, 1 on v)
    sinl : selects the 'x[p+half]' rotation (first half of each head, sign -)
    sinr : selects the 'x[p-half]' rotation (second half of each head, sign +)
    """
    half = HEAD_DIM // 2
    zeros_h = jnp.zeros((SEQ, half), jnp.float32)
    zeros_head = jnp.zeros((SEQ, HEAD_DIM), jnp.float32)

    cos_q = jnp.tile(cos, (1, N_HEADS)) * SCALING
    cos_k = jnp.tile(cos, (1, N_KV))
    cos_v = jnp.ones((SEQ, KV_DIM), jnp.float32)
    cosb = jnp.concatenate([cos_q, cos_k, cos_v], axis=1)

    sin_l_head = jnp.concatenate([-sin[:, :half], zeros_h], axis=1)
    sin_r_head = jnp.concatenate([zeros_h, sin[:, half:]], axis=1)
    sinl = jnp.concatenate([jnp.tile(sin_l_head, (1, N_HEADS)) * SCALING,
                            jnp.tile(sin_l_head, (1, N_KV)),
                            zeros_head if N_KV == 1 else jnp.tile(zeros_head, (1, N_KV))],
                           axis=1)
    sinr = jnp.concatenate([jnp.tile(sin_r_head, (1, N_HEADS)) * SCALING,
                            jnp.tile(sin_r_head, (1, N_KV)),
                            zeros_head if N_KV == 1 else jnp.tile(zeros_head, (1, N_KV))],
                           axis=1)
    return cosb, sinl, sinr


@jax.jit
def llama_decoder_layers(x, cos, sin, packed):
    """Run a stack of Llama decoder layers in one pallas_call.

    packed weights are stacked over a leading layer axis; n_layers == 1 is
    exactly LlamaDecoderLayer.forward (start_pos=0, no attention_mask).
    """
    n_layers = packed["wqkv"].shape[0]
    x2d = x.reshape(SEQ, HIDDEN).astype(jnp.float32)
    cosb, sinl, sinr = _rope_tables(cos.astype(jnp.float32), sin.astype(jnp.float32))

    def rep(shape):        # layer-invariant operand (stays resident)
        return pl.BlockSpec(shape, lambda l: (0,) * len(shape))

    def per_layer(shape):  # (n_layers, ...) operand, one layer slice per grid step
        return pl.BlockSpec((None,) + shape, lambda l: (l,) + (0,) * len(shape))

    out = pl.pallas_call(
        decoder_stack_kernel,
        out_shape=jax.ShapeDtypeStruct((SEQ, HIDDEN), jnp.float32),
        grid=(n_layers,),
        in_specs=[
            rep((SEQ, HIDDEN)),                         # x (initial hidden state)
            rep((SEQ, QKV_DIM)),                        # cosb
            rep((SEQ, QKV_DIM)),                        # sinl
            rep((SEQ, QKV_DIM)),                        # sinr
            per_layer((1, HIDDEN)),                     # input_layernorm weight (f32)
            per_layer((HIDDEN, QKV_DIM)),               # fused Wq|Wk|Wv  (bf16)
            per_layer((N_HEADS * HEAD_DIM, HIDDEN)),    # Wo              (bf16)
            per_layer((1, HIDDEN)),                     # post_attention_layernorm (f32)
            per_layer((HIDDEN, 2 * INTER)),             # fused Wgate|Wup (bf16)
            per_layer((INTER, HIDDEN)),                 # Wdown           (bf16)
        ],
        out_specs=pl.BlockSpec((SEQ, HIDDEN), lambda l: (0, 0)),
        compiler_params=pltpu.CompilerParams(
            dimension_semantics=("arbitrary",)),        # layers are sequential
    )(x2d, cosb, sinl, sinr,
      packed["w_in"], packed["wqkv"], packed["wo"],
      packed["w_post"], packed["wgu"], packed["wd"])
    return out.reshape(BATCH, SEQ, HIDDEN)


# --------------------------- pure-JAX reference -------------------------------
def layer_reference(h, cos, sin, w):
    """Faithful f32 re-implementation of LlamaDecoderLayer.forward (start_pos=0)."""
    def rms(v, g):
        var = jnp.mean(v * v, axis=-1, keepdims=True)
        return v * lax.rsqrt(var + EPS) * g

    xn = rms(h, w["w_in"])
    q = (xn @ w["wq"]).reshape(SEQ, N_HEADS, HEAD_DIM).transpose(1, 0, 2)
    k = (xn @ w["wk"]).reshape(SEQ, N_KV, HEAD_DIM).transpose(1, 0, 2)
    v = (xn @ w["wv"]).reshape(SEQ, N_KV, HEAD_DIM).transpose(1, 0, 2)

    half = HEAD_DIM // 2

    def rope(t):
        t1, t2 = t[..., :half], t[..., half:]
        return t * cos[None] + jnp.concatenate([-t2, t1], axis=-1) * sin[None]

    q, k = rope(q), rope(k)
    k = jnp.repeat(k, GROUPS, axis=0)
    v = jnp.repeat(v, GROUPS, axis=0)
    scores = jnp.einsum("hqd,hkd->hqk", q, k) * SCALING
    mask = jnp.tril(jnp.ones((SEQ, SEQ), bool))
    scores = jnp.where(mask[None], scores, -jnp.inf)
    p = jax.nn.softmax(scores, axis=-1)
    attn = jnp.einsum("hqk,hkd->hqd", p, v).transpose(1, 0, 2).reshape(SEQ, -1)
    h1 = h + attn @ w["wo"]
    hn = rms(h1, w["w_post"])
    return h1 + (jax.nn.silu(hn @ w["wg"]) * (hn @ w["wu"])) @ w["wd"]


# ------------------------------- main -----------------------------------------
if __name__ == "__main__":
    key = jax.random.PRNGKey(0)

    def bf16_weight(k, shape, scale=0.02):
        # weight values are bf16-representable so kernel (bf16 storage) and
        # f32 reference use numerically identical parameters
        w = scale * jax.random.normal(k, shape, jnp.float32)
        return w.astype(jnp.bfloat16).astype(jnp.float32)

    def make_layer(k):
        ks = jax.random.split(k, 9)
        return dict(
            w_in=(1.0 + 0.1 * jax.random.normal(ks[0], (1, HIDDEN))).astype(jnp.float32),
            w_post=(1.0 + 0.1 * jax.random.normal(ks[1], (1, HIDDEN))).astype(jnp.float32),
            wq=bf16_weight(ks[2], (HIDDEN, N_HEADS * HEAD_DIM)),
            wk=bf16_weight(ks[3], (HIDDEN, N_KV * HEAD_DIM)),
            wv=bf16_weight(ks[4], (HIDDEN, N_KV * HEAD_DIM)),
            wo=bf16_weight(ks[5], (N_HEADS * HEAD_DIM, HIDDEN)),
            wg=bf16_weight(ks[6], (HIDDEN, INTER)),
            wu=bf16_weight(ks[7], (HIDDEN, INTER)),
            wd=bf16_weight(ks[8], (INTER, HIDDEN)),
        )

    def pack_layers(layers):
        stack = lambda name: jnp.stack([lp[name] for lp in layers])
        return dict(
            w_in=stack("w_in"),
            w_post=stack("w_post"),
            wqkv=jnp.concatenate([stack("wq"), stack("wk"), stack("wv")],
                                 axis=-1).astype(jnp.bfloat16),
            wo=stack("wo").astype(jnp.bfloat16),
            wgu=jnp.concatenate([stack("wg"), stack("wu")],
                                axis=-1).astype(jnp.bfloat16),
            wd=stack("wd").astype(jnp.bfloat16),
        )

    key, kx, k0, k1 = jax.random.split(key, 4)
    x = jax.random.normal(kx, (BATCH, SEQ, HIDDEN), jnp.float32)

    # Llama rotary embeddings (theta = 10000), positions 0..SEQ-1 (start_pos=0)
    inv_freq = 1.0 / (10000.0 ** (jnp.arange(0, HEAD_DIM, 2, dtype=jnp.float32)
                                  / HEAD_DIM))
    pos = jnp.arange(SEQ, dtype=jnp.float32)
    freqs = jnp.outer(pos, inv_freq)                 # (S, hd/2)
    emb = jnp.concatenate([freqs, freqs], axis=-1)   # (S, hd)
    cos, sin = jnp.cos(emb), jnp.sin(emb)

    layers = [make_layer(k0), make_layer(k1)]

    # tolerance reflects TPU default matmul precision + approx reciprocal
    RTOL = ATOL = 5e-3

    # 1) single layer == the PyTorch module's forward
    out1 = jax.block_until_ready(
        llama_decoder_layers(x, cos, sin, pack_layers(layers[:1])))
    ref1 = layer_reference(x.reshape(SEQ, HIDDEN), cos, sin,
                           layers[0]).reshape(BATCH, SEQ, HIDDEN)
    assert out1.shape == (BATCH, SEQ, HIDDEN)
    assert jnp.allclose(out1, ref1, rtol=RTOL, atol=ATOL), (
        float(jnp.max(jnp.abs(out1 - ref1))))

    # 2) two stacked layers: exercises the layer-pipelined weight prefetch
    out2 = jax.block_until_ready(
        llama_decoder_layers(x, cos, sin, pack_layers(layers)))
    ref2 = x.reshape(SEQ, HIDDEN)
    for lp in layers:
        ref2 = layer_reference(ref2, cos, sin, lp)
    ref2 = ref2.reshape(BATCH, SEQ, HIDDEN)
    assert jnp.allclose(out2, ref2, rtol=RTOL, atol=ATOL), (
        float(jnp.max(jnp.abs(out2 - ref2))))

    print("KERNEL_OK")
</pallas_src>

<mosaic_0001>
module attributes {stable_mosaic.version = 11 : i64} {
  func.func @decoder_stack_kernel(%arg0: i32, %arg1: memref<8x128xf32, #tpu.memory_space<vmem>>, %arg2: memref<8x256xf32, #tpu.memory_space<vmem>>, %arg3: memref<8x256xf32, #tpu.memory_space<vmem>>, %arg4: memref<8x256xf32, #tpu.memory_space<vmem>>, %arg5: memref<1x1x128xf32, #tpu.memory_space<vmem>>, %arg6: memref<1x128x256xbf16, #tpu.memory_space<vmem>>, %arg7: memref<1x128x128xbf16, #tpu.memory_space<vmem>>, %arg8: memref<1x1x128xf32, #tpu.memory_space<vmem>>, %arg9: memref<1x128x512xbf16, #tpu.memory_space<vmem>>, %arg10: memref<1x256x128xbf16, #tpu.memory_space<vmem>>, %arg11: memref<8x128xf32, #tpu.memory_space<vmem>>) attributes {dimension_semantics = [#tpu.dimension_semantics<arbitrary>], iteration_bounds = array<i64: 1>, scalar_prefetch = 0 : i64, scratch_operands = 0 : i64, tpu.core_type = #tpu.core_type<tc>, window_params = [{pipeline_mode = #tpu.pipeline_mode<synchronous>, transform_indices = @transform_0, window_bounds = array<i64: 8, 128>}, {pipeline_mode = #tpu.pipeline_mode<synchronous>, transform_indices = @transform_1, window_bounds = array<i64: 8, 256>}, {pipeline_mode = #tpu.pipeline_mode<synchronous>, transform_indices = @transform_2, window_bounds = array<i64: 8, 256>}, {pipeline_mode = #tpu.pipeline_mode<synchronous>, transform_indices = @transform_3, window_bounds = array<i64: 8, 256>}, {transform_indices = @transform_4, window_bounds = array<i64: 1, 1, 128>}, {transform_indices = @transform_5, window_bounds = array<i64: 1, 128, 256>}, {transform_indices = @transform_6, window_bounds = array<i64: 1, 128, 128>}, {transform_indices = @transform_7, window_bounds = array<i64: 1, 1, 128>}, {transform_indices = @transform_8, window_bounds = array<i64: 1, 128, 512>}, {transform_indices = @transform_9, window_bounds = array<i64: 1, 256, 128>}, {pipeline_mode = #tpu.pipeline_mode<synchronous>, transform_indices = @transform_10, window_bounds = array<i64: 8, 128>}]} {
    %c0_i32 = arith.constant 0 : i32
    %0 = arith.cmpi eq, %arg0, %c0_i32 : i32
    %1 = arith.extui %0 : i1 to i32
    %c0_i32_0 = arith.constant 0 : i32
    %2 = arith.cmpi ne, %1, %c0_i32_0 : i32
    scf.if %2 {
      %c0_53 = arith.constant 0 : index
      %c0_54 = arith.constant 0 : index
      %138 = vector.load %arg1[%c0_53, %c0_54] : memref<8x128xf32, #tpu.memory_space<vmem>>, vector<8x128xf32>
      %c0_55 = arith.constant 0 : index
      %c0_56 = arith.constant 0 : index
      %139 = vector.load %arg11[%c0_55, %c0_56] : memref<8x128xf32, #tpu.memory_space<vmem>>, vector<8x128xf32>
      tpu.vector_store %arg11[%c0_55, %c0_56], %138 {strides = array<i32>} : memref<8x128xf32, #tpu.memory_space<vmem>>, vector<8x128xf32>,
    } else {
    }
    %c0 = arith.constant 0 : index
    %c0_1 = arith.constant 0 : index
    %3 = vector.load %arg11[%c0, %c0_1] : memref<8x128xf32, #tpu.memory_space<vmem>>, vector<8x128xf32>
    %c0_2 = arith.constant 0 : index
    %c0_3 = arith.constant 0 : index
    %c0_4 = arith.constant 0 : index
    %4 = vector.load %arg5[%c0_2, %c0_3, %c0_4] : memref<1x1x128xf32, #tpu.memory_space<vmem>>, vector<1x1x128xf32>
    %5 = vector.shape_cast %4 : vector<1x1x128xf32> to vector<1x128xf32>
    %6 = arith.mulf %3, %3 : vector<8x128xf32>
    %cst = arith.constant dense<0.000000e+00> : vector<8xf32>
    %7 = vector.multi_reduction <add>, %6, %cst [1] : vector<8x128xf32> to vector<8xf32>
    %8 = vector.shape_cast %7 : vector<8xf32> to vector<8x1xf32>
    %cst_5 = arith.constant 1.280000e+02 : f32
    %9 = vector.broadcast %cst_5 : f32 to vector<8x1xf32>
    %10 = arith.divf %8, %9 : vector<8x1xf32>
    %cst_6 = arith.constant 9.99999997E-7 : f32
    %11 = vector.broadcast %cst_6 : f32 to vector<8x1xf32>
    %12 = arith.addf %10, %11 : vector<8x1xf32>
    %13 = math.rsqrt %12 : vector<8x1xf32>
    %14 = vector.broadcast %13 : vector<8x1xf32> to vector<8x128xf32>
    %15 = arith.mulf %3, %14 : vector<8x128xf32>
    %16 = vector.broadcast %5 : vector<1x128xf32> to vector<8x128xf32>
    %17 = arith.mulf %15, %16 : vector<8x128xf32>
    %c0_7 = arith.constant 0 : index
    %c0_8 = arith.constant 0 : index
    %c0_9 = arith.constant 0 : index
    %18 = vector.load %arg6[%c0_7, %c0_8, %c0_9] : memref<1x128x256xbf16, #tpu.memory_space<vmem>>, vector<1x128x256xbf16>
    %19 = vector.shape_cast %18 : vector<1x128x256xbf16> to vector<128x256xbf16>
    %cst_10 = arith.constant dense<0.000000e+00> : vector<8x256xf32>
    %20 = tpu.matmul %17, %19, %cst_10 {dimension_numbers = #tpu.dot_dimension_numbers<[1], [0], [0], [1], [0, 0, 1, 1], [], []>} : vector<8x128xf32>, vector<128x256xbf16>, vector<8x256xf32> -> vector<8x256xf32>
    %21 = vector.extract_strided_slice %20 {offsets = [0, 16], sizes = [8, 240], strides = [1, 1]} : vector<8x256xf32> to vector<8x240xf32>
    %22 = vector.extract_strided_slice %20 {offsets = [0, 0], sizes = [8, 16], strides = [1, 1]} : vector<8x256xf32> to vector<8x16xf32>
    %23 = tpu.concatenate %21, %22 in 1 : vector<8x240xf32>, vector<8x16xf32> -> vector<8x256xf32>
    %24 = vector.extract_strided_slice %20 {offsets = [0, 240], sizes = [8, 16], strides = [1, 1]} : vector<8x256xf32> to vector<8x16xf32>
    %25 = vector.extract_strided_slice %20 {offsets = [0, 0], sizes = [8, 240], strides = [1, 1]} : vector<8x256xf32> to vector<8x240xf32>
    %26 = tpu.concatenate %24, %25 in 1 : vector<8x16xf32>, vector<8x240xf32> -> vector<8x256xf32>
    %c0_11 = arith.constant 0 : index
    %c0_12 = arith.constant 0 : index
    %27 = vector.load %arg2[%c0_11, %c0_12] : memref<8x256xf32, #tpu.memory_space<vmem>>, vector<8x256xf32>
    %28 = arith.mulf %20, %27 : vector<8x256xf32>
    %c0_13 = arith.constant 0 : index
    %c0_14 = arith.constant 0 : index
    %29 = vector.load %arg3[%c0_13, %c0_14] : memref<8x256xf32, #tpu.memory_space<vmem>>, vector<8x256xf32>
    %30 = arith.mulf %23, %29 : vector<8x256xf32>
    %31 = arith.addf %28, %30 : vector<8x256xf32>
    %c0_15 = arith.constant 0 : index
    %c0_16 = arith.constant 0 : index
    %32 = vector.load %arg4[%c0_15, %c0_16] : memref<8x256xf32, #tpu.memory_space<vmem>>, vector<8x256xf32>
    %33 = arith.mulf %26, %32 : vector<8x256xf32>
    %34 = arith.addf %31, %33 : vector<8x256xf32>
    %35 = vector.extract_strided_slice %34 {offsets = [0, 0], sizes = [8, 128], strides = [1, 1]} : vector<8x256xf32> to vector<8x128xf32>
    %36 = vector.extract_strided_slice %34 {offsets = [0, 128], sizes = [8, 64], strides = [1, 1]} : vector<8x256xf32> to vector<8x64xf32>
    %37 = vector.extract_strided_slice %34 {offsets = [0, 192], sizes = [8, 64], strides = [1, 1]} : vector<8x256xf32> to vector<8x64xf32>
    %38 = tpu.iota {dimensions = array<i32: 0>} : vector<16x8xi32>
    %39 = tpu.iota {dimensions = array<i32: 1>} : vector<16x8xi32>
    %c8_i32 = arith.constant 8 : i32
    %c0_i32_17 = arith.constant 0 : i32
    %40 = arith.cmpi eq, %c8_i32, %c0_i32_17 : i32
    %c1_i32 = arith.constant 1 : i32
    %41 = arith.select %40, %c1_i32, %c8_i32 : i32
    %42 = vector.broadcast %41 : i32 to vector<16x8xi32>
    %43 = arith.remsi %38, %42 : vector<16x8xi32>
    %c0_i32_18 = arith.constant 0 : i32
    %44 = vector.broadcast %c0_i32_18 : i32 to vector<16x8xi32>
    %45 = arith.cmpi ne, %43, %44 : vector<16x8xi32>
    %c0_i32_19 = arith.constant 0 : i32
    %46 = vector.broadcast %c0_i32_19 : i32 to vector<16x8xi32>
    %47 = arith.cmpi slt, %43, %46 : vector<16x8xi32>
    %c0_i32_20 = arith.constant 0 : i32
    %48 = arith.cmpi slt, %41, %c0_i32_20 : i32
    %49 = vector.broadcast %48 : i1 to vector<16x8xi1>
    %50 = vector.broadcast %49 : vector<16x8xi1> to vector<16x8xi1>
    %51 = arith.xori %47, %50 : vector<16x8xi1>
    %52 = arith.andi %51, %45 : vector<16x8xi1>
    %53 = vector.broadcast %41 : i32 to vector<16x8xi32>
    %54 = arith.addi %43, %53 : vector<16x8xi32>
    %55 = arith.select %52, %54, %43 : vector<16x8xi1>, vector<16x8xi32>
    %56 = arith.cmpi sge, %55, %39 : vector<16x8xi32>
    %57 = vector.extract_strided_slice %36 {offsets = [0, 0], sizes = [8, 32], strides = [1, 1]} : vector<8x64xf32> to vector<8x32xf32>
    %58 = vector.extract_strided_slice %37 {offsets = [0, 0], sizes = [8, 32], strides = [1, 1]} : vector<8x64xf32> to vector<8x32xf32>
    %59 = vector.extract_strided_slice %35 {offsets = [0, 0], sizes = [8, 32], strides = [1, 1]} : vector<8x128xf32> to vector<8x32xf32>
    %60 = vector.extract_strided_slice %35 {offsets = [0, 32], sizes = [8, 32], strides = [1, 1]} : vector<8x128xf32> to vector<8x32xf32>
    %61 = tpu.concatenate %59, %60 in 0 : vector<8x32xf32>, vector<8x32xf32> -> vector<16x32xf32>
    %62 = tpu.transpose %57, [1, 0] : vector<8x32xf32> -> vector<32x8xf32>
    %cst_21 = arith.constant dense<0.000000e+00> : vector<16x8xf32>
    %63 = tpu.matmul %61, %62, %cst_21 {dimension_numbers = #tpu.dot_dimension_numbers<[1], [0], [0], [1], [0, 0, 1, 1], [], []>} : vector<16x32xf32>, vector<32x8xf32>, vector<16x8xf32> -> vector<16x8xf32>
    %cst_22 = arith.constant -1.000000e+30 : f32
    %64 = vector.broadcast %cst_22 : f32 to vector<16x8xf32>
    %65 = arith.select %56, %63, %64 : vector<16x8xi1>, vector<16x8xf32>
    %cst_23 = arith.constant dense<0xFF800000> : vector<16xf32>
    %66 = vector.multi_reduction <maximumf>, %65, %cst_23 [1] : vector<16x8xf32> to vector<16xf32>
    %67 = vector.shape_cast %66 : vector<16xf32> to vector<16x1xf32>
    %68 = vector.broadcast %67 : vector<16x1xf32> to vector<16x8xf32>
    %69 = arith.subf %65, %68 : vector<16x8xf32>
    %70 = math.exp %69 : vector<16x8xf32>
    %cst_24 = arith.constant dense<0.000000e+00> : vector<16xf32>
    %71 = vector.multi_reduction <add>, %70, %cst_24 [1] : vector<16x8xf32> to vector<16xf32>
    %72 = vector.shape_cast %71 : vector<16xf32> to vector<16x1xf32>
    %73 = tpu.reciprocal %72 {approx = true} : vector<16x1xf32> -> vector<16x1xf32>
    %74 = vector.broadcast %73 : vector<16x1xf32> to vector<16x8xf32>
    %75 = arith.mulf %70, %74 : vector<16x8xf32>
    %cst_25 = arith.constant dense<0.000000e+00> : vector<16x32xf32>
    %76 = tpu.matmul %75, %58, %cst_25 {dimension_numbers = #tpu.dot_dimension_numbers<[1], [0], [0], [1], [0, 0, 1, 1], [], []>} : vector<16x8xf32>, vector<8x32xf32>, vector<16x32xf32> -> vector<16x32xf32>
    %77 = vector.extract_strided_slice %76 {offsets = [0, 0], sizes = [8, 32], strides = [1, 1]} : vector<16x32xf32> to vector<8x32xf32>
    %78 = vector.extract_strided_slice %76 {offsets = [8, 0], sizes = [8, 32], strides = [1, 1]} : vector<16x32xf32> to vector<8x32xf32>
    %79 = vector.extract_strided_slice %36 {offsets = [0, 32], sizes = [8, 32], strides = [1, 1]} : vector<8x64xf32> to vector<8x32xf32>
    %80 = vector.extract_strided_slice %37 {offsets = [0, 32], sizes = [8, 32], strides = [1, 1]} : vector<8x64xf32> to vector<8x32xf32>
    %81 = vector.extract_strided_slice %35 {offsets = [0, 64], sizes = [8, 32], strides = [1, 1]} : vector<8x128xf32> to vector<8x32xf32>
    %82 = vector.extract_strided_slice %35 {offsets = [0, 96], sizes = [8, 32], strides = [1, 1]} : vector<8x128xf32> to vector<8x32xf32>
    %83 = tpu.concatenate %81, %82 in 0 : vector<8x32xf32>, vector<8x32xf32> -> vector<16x32xf32>
    %84 = tpu.transpose %79, [1, 0] : vector<8x32xf32> -> vector<32x8xf32>
    %cst_26 = arith.constant dense<0.000000e+00> : vector<16x8xf32>
    %85 = tpu.matmul %83, %84, %cst_26 {dimension_numbers = #tpu.dot_dimension_numbers<[1], [0], [0], [1], [0, 0, 1, 1], [], []>} : vector<16x32xf32>, vector<32x8xf32>, vector<16x8xf32> -> vector<16x8xf32>
    %cst_27 = arith.constant -1.000000e+30 : f32
    %86 = vector.broadcast %cst_27 : f32 to vector<16x8xf32>
    %87 = arith.select %56, %85, %86 : vector<16x8xi1>, vector<16x8xf32>
    %cst_28 = arith.constant dense<0xFF800000> : vector<16xf32>
    %88 = vector.multi_reduction <maximumf>, %87, %cst_28 [1] : vector<16x8xf32> to vector<16xf32>
    %89 = vector.shape_cast %88 : vector<16xf32> to vector<16x1xf32>
    %90 = vector.broadcast %89 : vector<16x1xf32> to vector<16x8xf32>
    %91 = arith.subf %87, %90 : vector<16x8xf32>
    %92 = math.exp %91 : vector<16x8xf32>
    %cst_29 = arith.constant dense<0.000000e+00> : vector<16xf32>
    %93 = vector.multi_reduction <add>, %92, %cst_29 [1] : vector<16x8xf32> to vector<16xf32>
    %94 = vector.shape_cast %93 : vector<16xf32> to vector<16x1xf32>
    %95 = tpu.reciprocal %94 {approx = true} : vector<16x1xf32> -> vector<16x1xf32>
    %96 = vector.broadcast %95 : vector<16x1xf32> to vector<16x8xf32>
    %97 = arith.mulf %92, %96 : vector<16x8xf32>
    %cst_30 = arith.constant dense<0.000000e+00> : vector<16x32xf32>
    %98 = tpu.matmul %97, %80, %cst_30 {dimension_numbers = #tpu.dot_dimension_numbers<[1], [0], [0], [1], [0, 0, 1, 1], [], []>} : vector<16x8xf32>, vector<8x32xf32>, vector<16x32xf32> -> vector<16x32xf32>
    %99 = vector.extract_strided_slice %98 {offsets = [0, 0], sizes = [8, 32], strides = [1, 1]} : vector<16x32xf32> to vector<8x32xf32>
    %100 = vector.extract_strided_slice %98 {offsets = [8, 0], sizes = [8, 32], strides = [1, 1]} : vector<16x32xf32> to vector<8x32xf32>
    %101 = tpu.concatenate %77, %78, %99, %100 in 1 : vector<8x32xf32>, vector<8x32xf32>, vector<8x32xf32>, vector<8x32xf32> -> vector<8x128xf32>
    %c0_31 = arith.constant 0 : index
    %c0_32 = arith.constant 0 : index
    %c0_33 = arith.constant 0 : index
    %102 = vector.load %arg7[%c0_31, %c0_32, %c0_33] : memref<1x128x128xbf16, #tpu.memory_space<vmem>>, vector<1x128x128xbf16>
    %103 = vector.shape_cast %102 : vector<1x128x128xbf16> to vector<128x128xbf16>
    %cst_34 = arith.constant dense<0.000000e+00> : vector<8x128xf32>
    %104 = tpu.matmul %101, %103, %cst_34 {dimension_numbers = #tpu.dot_dimension_numbers<[1], [0], [0], [1], [0, 0, 1, 1], [], []>} : vector<8x128xf32>, vector<128x128xbf16>, vector<8x128xf32> -> vector<8x128xf32>
    %105 = arith.addf %3, %104 : vector<8x128xf32>
    %c0_35 = arith.constant 0 : index
    %c0_36 = arith.constant 0 : index
    %c0_37 = arith.constant 0 : index
    %106 = vector.load %arg8[%c0_35, %c0_36, %c0_37] : memref<1x1x128xf32, #tpu.memory_space<vmem>>, vector<1x1x128xf32>
    %107 = vector.shape_cast %106 : vector<1x1x128xf32> to vector<1x128xf32>
    %108 = arith.mulf %105, %105 : vector<8x128xf32>
    %cst_38 = arith.constant dense<0.000000e+00> : vector<8xf32>
    %109 = vector.multi_reduction <add>, %108, %cst_38 [1] : vector<8x128xf32> to vector<8xf32>
    %110 = vector.shape_cast %109 : vector<8xf32> to vector<8x1xf32>
    %cst_39 = arith.constant 1.280000e+02 : f32
    %111 = vector.broadcast %cst_39 : f32 to vector<8x1xf32>
    %112 = arith.divf %110, %111 : vector<8x1xf32>
    %cst_40 = arith.constant 9.99999997E-7 : f32
    %113 = vector.broadcast %cst_40 : f32 to vector<8x1xf32>
    %114 = arith.addf %112, %113 : vector<8x1xf32>
    %115 = math.rsqrt %114 : vector<8x1xf32>
    %116 = vector.broadcast %115 : vector<8x1xf32> to vector<8x128xf32>
    %117 = arith.mulf %105, %116 : vector<8x128xf32>
    %118 = vector.broadcast %107 : vector<1x128xf32> to vector<8x128xf32>
    %119 = arith.mulf %117, %118 : vector<8x128xf32>
    %c0_41 = arith.constant 0 : index
    %c0_42 = arith.constant 0 : index
    %c0_43 = arith.constant 0 : index
    %120 = vector.load %arg9[%c0_41, %c0_42, %c0_43] : memref<1x128x512xbf16, #tpu.memory_space<vmem>>, vector<1x128x512xbf16>
    %121 = vector.shape_cast %120 : vector<1x128x512xbf16> to vector<128x512xbf16>
    %cst_44 = arith.constant dense<0.000000e+00> : vector<8x512xf32>
    %122 = tpu.matmul %119, %121, %cst_44 {dimension_numbers = #tpu.dot_dimension_numbers<[1], [0], [0], [1], [0, 0, 1, 1], [], []>} : vector<8x128xf32>, vector<128x512xbf16>, vector<8x512xf32> -> vector<8x512xf32>
    %123 = vector.extract_strided_slice %122 {offsets = [0, 0], sizes = [8, 256], strides = [1, 1]} : vector<8x512xf32> to vector<8x256xf32>
    %124 = vector.extract_strided_slice %122 {offsets = [0, 256], sizes = [8, 256], strides = [1, 1]} : vector<8x512xf32> to vector<8x256xf32>
    %cst_45 = arith.constant 0.000000e+00 : f32
    %125 = vector.broadcast %cst_45 : f32 to vector<8x256xf32>
    %126 = arith.subf %125, %123 : vector<8x256xf32>
    %127 = math.exp %126 : vector<8x256xf32>
    %cst_46 = arith.constant 1.000000e+00 : f32
    %128 = vector.broadcast %cst_46 : f32 to vector<8x256xf32>
    %129 = arith.addf %128, %127 : vector<8x256xf32>
    %130 = tpu.reciprocal %129 {approx = true} : vector<8x256xf32> -> vector<8x256xf32>
    %131 = arith.mulf %123, %130 : vector<8x256xf32>
    %132 = arith.mulf %131, %124 : vector<8x256xf32>
    %c0_47 = arith.constant 0 : index
    %c0_48 = arith.constant 0 : index
    %c0_49 = arith.constant 0 : index
    %133 = vector.load %arg10[%c0_47, %c0_48, %c0_49] : memref<1x256x128xbf16, #tpu.memory_space<vmem>>, vector<1x256x128xbf16>
    %134 = vector.shape_cast %133 : vector<1x256x128xbf16> to vector<256x128xbf16>
    %cst_50 = arith.constant dense<0.000000e+00> : vector<8x128xf32>
    %135 = tpu.matmul %132, %134, %cst_50 {dimension_numbers = #tpu.dot_dimension_numbers<[1], [0], [0], [1], [0, 0, 1, 1], [], []>} : vector<8x256xf32>, vector<256x128xbf16>, vector<8x128xf32> -> vector<8x128xf32>
    %136 = arith.addf %105, %135 : vector<8x128xf32>
    %c0_51 = arith.constant 0 : index
    %c0_52 = arith.constant 0 : index
    %137 = vector.load %arg11[%c0_51, %c0_52] : memref<8x128xf32, #tpu.memory_space<vmem>>, vector<8x128xf32>
    tpu.vector_store %arg11[%c0_51, %c0_52], %136 {strides = array<i32>} : memref<8x128xf32, #tpu.memory_space<vmem>>, vector<8x128xf32>,
    return
  }
  func.func @transform_0(%arg0: i32) -> (i32, i32) {
    %c0_i32 = arith.constant 0 : i32
    %c0_i32_0 = arith.constant 0 : i32
    %c0_i32_1 = arith.constant 0 : i32
    return %c0_i32, %c0_i32_0 : i32, i32
  }
  func.func @transform_1(%arg0: i32) -> (i32, i32) {
    %c0_i32 = arith.constant 0 : i32
    %c0_i32_0 = arith.constant 0 : i32
    %c0_i32_1 = arith.constant 0 : i32
    return %c0_i32, %c0_i32_0 : i32, i32
  }
  func.func @transform_2(%arg0: i32) -> (i32, i32) {
    %c0_i32 = arith.constant 0 : i32
    %c0_i32_0 = arith.constant 0 : i32
    %c0_i32_1 = arith.constant 0 : i32
    return %c0_i32, %c0_i32_0 : i32, i32
  }
  func.func @transform_3(%arg0: i32) -> (i32, i32) {
    %c0_i32 = arith.constant 0 : i32
    %c0_i32_0 = arith.constant 0 : i32
    %c0_i32_1 = arith.constant 0 : i32
    return %c0_i32, %c0_i32_0 : i32, i32
  }
  func.func @transform_4(%arg0: i32) -> (i32, i32, i32) {
    %c0_i32 = arith.constant 0 : i32
    %c0_i32_0 = arith.constant 0 : i32
    %c0_i32_1 = arith.constant 0 : i32
    return %arg0, %c0_i32, %c0_i32_0 : i32, i32, i32
  }
  func.func @transform_5(%arg0: i32) -> (i32, i32, i32) {
    %c0_i32 = arith.constant 0 : i32
    %c0_i32_0 = arith.constant 0 : i32
    %c0_i32_1 = arith.constant 0 : i32
    return %arg0, %c0_i32, %c0_i32_0 : i32, i32, i32
  }
  func.func @transform_6(%arg0: i32) -> (i32, i32, i32) {
    %c0_i32 = arith.constant 0 : i32
    %c0_i32_0 = arith.constant 0 : i32
    %c0_i32_1 = arith.constant 0 : i32
    return %arg0, %c0_i32, %c0_i32_0 : i32, i32, i32
  }
  func.func @transform_7(%arg0: i32) -> (i32, i32, i32) {
    %c0_i32 = arith.constant 0 : i32
    %c0_i32_0 = arith.constant 0 : i32
    %c0_i32_1 = arith.constant 0 : i32
    return %arg0, %c0_i32, %c0_i32_0 : i32, i32, i32
  }
  func.func @transform_8(%arg0: i32) -> (i32, i32, i32) {
    %c0_i32 = arith.constant 0 : i32
    %c0_i32_0 = arith.constant 0 : i32
    %c0_i32_1 = arith.constant 0 : i32
    return %arg0, %c0_i32, %c0_i32_0 : i32, i32, i32
  }
  func.func @transform_9(%arg0: i32) -> (i32, i32, i32) {
    %c0_i32 = arith.constant 0 : i32
    %c0_i32_0 = arith.constant 0 : i32
    %c0_i32_1 = arith.constant 0 : i32
    return %arg0, %c0_i32, %c0_i32_0 : i32, i32, i32
  }
  func.func @transform_10(%arg0: i32) -> (i32, i32) {
    %c0_i32 = arith.constant 0 : i32
    %c0_i32_0 = arith.constant 0 : i32
    %c0_i32_1 = arith.constant 0 : i32
    return %c0_i32, %c0_i32_0 : i32, i32
  }
}

</mosaic_0001>

<bundles_post_ra>
// kernel: tile.49
= control target key start
LH: loop header
LB: loop body
LE: loop exit
PB: predicated region body
PF: predicated region fallthrough
CT: control target
= control target key end

     0   :  { %vm42_vm0 = vcmask 1047556   ;;  %vm44_vm1 = vcmask 261120   ;;  %vm54_vm2 = vcmask 523520   ;;  %s111_s0 = inlined_call_operand.vmem [shape: f32[8,2,32], index: 0, kind: input, shape index: {}]   ;;  %s112_s1 = inlined_call_operand.vmem [shape: f32[8,64], index: 1, kind: output, shape index: {}]  }
   0x1   :  { %v62_v0 = vld [vmem:[%s111_s0 + $0xe] sm:$0x3]  ;;  %v63_v1 = vld [vmem:[%s111_s0 + $0xc] sm:$0x3]  ;;  %v64_v2 = vld [vmem:[%s111_s0 + $0xa] sm:$0x3] }
   0x2   :  { %8 = vst [vmem:[#allocation0 + $0x38] sm:$0x3] %v62_v0  ;;  %13 = vst [vmem:[#allocation0 + $0x30] sm:$0x3] %v63_v1  ;;  %v65_v3 = vld [vmem:[%s111_s0 + $0x8] sm:$0x3] }
   0x3   :  { %18 = vst [vmem:[#allocation0 + $0x28] sm:$0x3] %v64_v2  ;;  %v66_v4 = vld [vmem:[%s111_s0 + $0x6] sm:$0x3]  ;;  %v67_v5 = vld [vmem:[%s111_s0 + $0x4] sm:$0x3] }
   0x4   :  { %23 = vst [vmem:[#allocation0 + $0x20] sm:$0x3] %v65_v3  ;;  %28 = vst [vmem:[#allocation0 + $0x18] sm:$0x3] %v66_v4  ;;  %v68_v6 = vld [vmem:[%s111_s0 + $0x2] sm:$0x3] }
   0x5   :  { %33 = vst [vmem:[#allocation0 + $0x10] sm:$0x3] %v67_v5  ;;  %v38_v7 = vld [vmem:[%s111_s0] sm:$0x3]  ;;  %37 = vst [vmem:[#allocation0 + $0x8] sm:$0x3] %v68_v6 }
   0x6   :  { %39 = vst [vmem:[#allocation0] sm:$0x3] %v38_v7  ;;  %s70_s0 = smov 32  }
   0xb   :  { %v41_v8 = vld [vmem:[#allocation0] ss:$8 sm:$0xf0]   ;;  %v49_v9 = vld [vmem:[#allocation0 + $0x1] ss:$8 sm:$0xf0]  }
   0xd   :  { %v40_v10 = vld [vmem:[#allocation0] ss:$8 sm:$0xf]   ;;  %v47_v11 = vld [vmem:[#allocation0 + $0x1] ss:$8 sm:$0xf]  }
   0xe   :  { %v43_v12 = vsel %vm42_vm0, %v41_v8, %v40_v10  ;;  %v51_v13 = vsel %vm42_vm0, %v49_v9, %v47_v11 }
   0xf   :  { %52 = vrot.lane.b32.xlu0 %v51_v13, %s70_s0  ;;  %45 = vst.msk [vmem:[%s112_s1] sm:$0xff] %vm44_vm1, %v43_v12  }
  0x81   :  { %v53_v14 = vpop.permute.xlu0 %52  }
  0x82   :  { %55 = vst.msk [vmem:[%s112_s1] sm:$0xff] %vm54_vm2, %v53_v14  }

// kernel: llama_decoder_layers.1
= control target key start
LH: loop header
LB: loop body
LE: loop exit
PB: predicated region body
PF: predicated region fallthrough
CT: control target
= control target key end

     0   :  { %v1574_v17 = vmov 0.0   ;;  %s1970_s0 = inlined_call_operand.vmem [shape: f32[8,128], index: 0, kind: input, shape index: {}]   ;;  %s1971_s1 = inlined_call_operand.vmem [shape: f32[8,256], index: 1, kind: input, shape index: {}]   ;;  %s1972_s2 = inlined_call_operand.vmem [shape: f32[8,256], index: 2, kind: input, shape index: {}]   ;;  %s1973_s3 = inlined_call_operand.vmem [shape: f32[8,256], index: 3, kind: input, shape index: {}]   ;;  %s1974_s4 = inlined_call_operand.vmem [shape: f32[1,1,128], index: 4, kind: input, shape index: {}]   ;;  %s1975_s5 = inlined_call_operand.vmem [shape: bf16[1,128,256], index: 5, kind: input, shape index: {}]   ;;  %s1976_s6 = inlined_call_operand.vmem [shape: bf16[1,128,128], index: 6, kind: input, shape index: {}]   ;;  %s1977_s7 = inlined_call_operand.vmem [shape: f32[1,1,128], index: 7, kind: input, shape index: {}]   ;;  %s1978_s8 = inlined_call_operand.vmem [shape: bf16[1,128,512], index: 8, kind: input, shape index: {}]   ;;  %s1979_s9 = inlined_call_operand.vmem [shape: bf16[1,256,128], index: 9, kind: input, shape index: {}]   ;;  %s1980_s10 = inlined_call_operand.hbm [shape: f32[8,128], index: 10, kind: output, shape index: {}]  }
   0x1   :  { %v1640_v0 = vld [vmem:[%s1970_s0] sm:$0xff]  ;;  %v1429_v4 = vld [vmem:[%s1975_s5 + $0x14] ss:$8 sps:$4 sm:$0xff]   ;;  %v1431_v5 = vld [vmem:[%s1975_s5 + $0x10] ss:$8 sps:$4 sm:$0xff]   ;;  %188 = vmatprep.mubr.f32.mxu0 %v1574_v17 }
   0x2   :  { %v45_v1 = vmul.f32 %v1640_v0, %v1640_v0  ;;  %v1426_v2 = vld [vmem:[%s1975_s5 + $0x4] ss:$8 sps:$4 sm:$0xff]   ;;  %v1428_v3 = vld [vmem:[%s1975_s5] ss:$8 sps:$4 sm:$0xff]   ;;  %v1435_v8 = vld [vmem:[%s1975_s5 + $0x34] ss:$8 sps:$4 sm:$0xff]  }
   0x3   :  { %156 = vmatprep.subr.bf16.mxu0 %v1426_v2  ;;  %v1432_v6 = vld [vmem:[%s1975_s5 + $0x24] ss:$8 sps:$4 sm:$0xff]   ;;  %v1434_v7 = vld [vmem:[%s1975_s5 + $0x20] ss:$8 sps:$4 sm:$0xff]   ;;  %v1437_v9 = vld [vmem:[%s1975_s5 + $0x30] ss:$8 sps:$4 sm:$0xff]  }
   0x4   :  { %46 = vadd.xlane.f32.xlu0 %v45_v1  ;;  %157 = vmatpush1.bf16.msra.mxu0 %v1428_v3  ;;  %v1438_v10 = vld [vmem:[%s1975_s5 + $0x44] ss:$8 sps:$4 sm:$0xff]   ;;  %v1440_v11 = vld [vmem:[%s1975_s5 + $0x40] ss:$8 sps:$4 sm:$0xff]   ;;  %v1441_v12 = vld [vmem:[%s1975_s5 + $0x54] ss:$8 sps:$4 sm:$0xff]  }
   0x5   :  { %158 = vmatprep.subr.bf16.mxu0 %v1429_v4  ;;  %v1443_v13 = vld [vmem:[%s1975_s5 + $0x50] ss:$8 sps:$4 sm:$0xff]   ;;  %v1444_v14 = vld [vmem:[%s1975_s5 + $0x64] ss:$8 sps:$4 sm:$0xff]   ;;  %v1446_v15 = vld [vmem:[%s1975_s5 + $0x60] ss:$8 sps:$4 sm:$0xff]  }
   0x6   :  { %v1447_v16 = vld [vmem:[%s1975_s5 + $0x74] ss:$8 sps:$4 sm:$0xff]   ;;  %v1449_v18 = vld [vmem:[%s1975_s5 + $0x70] ss:$8 sps:$4 sm:$0xff]  }
   0x8   :  { %159 = vmatpush1.bf16.msra.mxu0 %v1431_v5 }
   0x9   :  { %160 = vmatprep.subr.bf16.mxu0 %v1432_v6 }
   0xc   :  { %161 = vmatpush1.bf16.msra.mxu0 %v1434_v7 }
   0xd   :  { %162 = vmatprep.subr.bf16.mxu0 %v1435_v8 }
  0x10   :  { %163 = vmatpush1.bf16.msra.mxu0 %v1437_v9 }
  0x11   :  { %164 = vmatprep.subr.bf16.mxu0 %v1438_v10 }
  0x14   :  { %165 = vmatpush1.bf16.msra.mxu0 %v1440_v11 }
  0x15   :  { %166 = vmatprep.subr.bf16.mxu0 %v1441_v12 }
  0x18   :  { %167 = vmatpush1.bf16.msra.mxu0 %v1443_v13 }
  0x19   :  { %168 = vmatprep.subr.bf16.mxu0 %v1444_v14 }
  0x1c   :  { %169 = vmatpush1.bf16.msra.mxu0 %v1446_v15 }
  0x1d   :  { %170 = vmatprep.subr.bf16.mxu0 %v1447_v16 }
  0x20   :  { %171 = vmatpush1.bf16.msra.mxu0 %v1449_v18 }
  0x21   :  { %15 = vsyncpa [#allocation3], 0  ;;  %v1255_v23 = vld [vmem:[%s1974_s4] ss:$0 sm:$0xff]  ;;  %s1575_s5 = smov 112   ;;  %s1576_s27 = smov 16   ;;  %v233_v53 = vlaneseq }
  0x22   :  { %vm201_vm0 = vcmask 916480   ;;  %v221_v30 = vld [vmem:[%s1972_s2] sm:$0xff]  ;;  %v222_v31 = vld [vmem:[%s1972_s2 + $0x8] sm:$0xff]  ;;  %vm212_vm1 = vcmask 130048   ;;  %vm267_vm2 = vcmask 261120   ;;  %vm352_vm5 = vcmask 64512  }
  0x23   :  { %v217_v35 = vld [vmem:[%s1971_s1] sm:$0xff]  ;;  %v218_v36 = vld [vmem:[%s1971_s1 + $0x8] sm:$0xff]  ;;  %s1577_s1 = smov 96   ;;  %v234_v54 = vshrl.u32 %v233_v53, 7  ;;  %v237_v56 = vand.u32 127, %v233_v53  ;;  %s1579_s18 = smov 32  }
  0x24   :  { %v227_v39 = vld [vmem:[%s1973_s3] sm:$0xff]  ;;  %v228_v40 = vld [vmem:[%s1973_s3 + $0x8] sm:$0xff]  ;;  %s1578_s3 = smov 64   ;;  %v1453_v53 = vld [vmem:[%s1976_s6 + $0x18] sm:$0xff]   ;;  %vm1580_vm6 = vmmov 0   ;;  %vm667_vm7 = vcmask 523264  }
  0x25   :  { %v235_v55 = vadd.s32 8, %v234_v54  ;;  %v242_v58 = vand.u32 7, %v234_v54  ;;  %v1454_v54 = vld [vmem:[%s1976_s6 + $0x20] sm:$0xff]   ;;  %vm669_vm8 = vcmask 785408  }
  0x27   :  { %v249_v57 = vand.u32 7, %v235_v55  ;;  %vm1729_vm4 = vcmp.ge.s32.totalorder %v242_v58, %v237_v56  ;;  %v1455_v55 = vld [vmem:[%s1976_s6 + $0x28] sm:$0xff]  }
  0x29   :  { %vm1725_vm3 = vcmp.ge.s32.totalorder %v249_v57, %v237_v56  ;;  %v1456_v56 = vld [vmem:[%s1976_s6 + $0x30] sm:$0xff]   ;;  %v1457_v57 = vld [vmem:[%s1976_s6 + $0x38] sm:$0xff]  }
  0x91   :  { %v47_v19 = vpop.xlane.xlu0 %46 }
  0x92   :  { %v49_v20 = vmul.f32 0.0078125, %v47_v19 }
  0x94   :  { %v50_v21 = vadd.f32 1e-06, %v49_v20 }
  0x96   :  { %1522 = vrsqrt.f32 %v50_v21 }
  0xa0   :  { %v1523_v22 = vpop.eup %1522 }
  0xa1   :  { %v52_v24 = vmul.f32 %v1523_v22, %v1640_v0 }
  0xa3   :  { %v59_v25 = vmul.f32 %v1255_v23, %v52_v24 }
  0xa5   :  { %189 = vmatmul.mubr.f32.vlgmr.msra.gmra.mrb[0].mxu0 %v59_v25 }
  0xa6   :  { %1013 = vmatprep.mubr.f32.mxu0 %v1574_v17 }
 0x178   :  { %v190_v26 = vpop.f32.mrb[0].mxu0 }
 0x179   :  { %197 = vrot.lane.b32.xlu0 %v190_v26, %s1575_s5  ;;  %v192_v27 = vpop.f32.mrb[1].mxu0  ;;  %v219_v41 = vmul.f32 %v217_v35, %v190_v26 }
 0x17a   :  { %199 = vrot.lane.b32.xlu1 %v192_v27, %s1575_s5  ;;  %v220_v42 = vmul.f32 %v218_v36, %v192_v27 }
 0x17e   :  { %207 = vrot.lane.b32.xlu1 %v192_v27, %s1576_s27 }
 0x182   :  { %210 = vrot.lane.b32.xlu1 %v190_v26, %s1576_s27 }
 0x1eb   :  { %v198_v28 = vpop.permute.xlu0 %197 }
 0x1ec   :  { %v200_v29 = vpop.permute.xlu1 %199 }
 0x1ed   :  { %v202_v32 = vsel %vm201_vm0, %v198_v28, %v200_v29  ;;  %v206_v33 = vsel %vm201_vm0, %v200_v29, %v198_v28 }
 0x1ee   :  { %v223_v37 = vmul.f32 %v221_v30, %v202_v32  ;;  %v224_v38 = vmul.f32 %v222_v31, %v206_v33 }
 0x1f0   :  { %v208_v34 = vpop.permute.xlu1 %207  ;;  %v225_v46 = vadd.f32 %v223_v37, %v219_v41  ;;  %v226_v47 = vadd.f32 %v224_v38, %v220_v42 }
 0x1f4   :  { %v211_v43 = vpop.permute.xlu1 %210 }
 0x1f5   :  { %v213_v44 = vsel %vm212_vm1, %v211_v43, %v208_v34  ;;  %v216_v45 = vsel %vm212_vm1, %v208_v34, %v211_v43 }
 0x1f6   :  { %v229_v48 = vmul.f32 %v227_v39, %v216_v45  ;;  %v230_v49 = vmul.f32 %v228_v40, %v213_v44 }
 0x1f8   :  { %v1716_v50 = vadd.f32 %v230_v49, %v226_v47  ;;  %v231_v51 = vadd.f32 %v229_v48, %v225_v46 }
 0x1fa   :  { %265 = vrot.lane.b32.xlu1 %v231_v51, %s1577_s1  ;;  %1379 = vmatprep.subr.msk.mxu1 %vm267_vm2, %v1716_v50 }
 0x1fb   :  { %1381 = vmatprep.mubr.msk.f32.mxu1 %vm267_vm2, %v231_v51  ;;  %1380 = vmatpush3.xpose.msk.msra.mxu1 %vm267_vm2, %v1716_v50 }
 0x26c   :  { %v266_v52 = vpop.permute.xlu1 %265 }
 0x26d   :  { %1382 = vmatmul.mubr.msk.f32.vlgmr.msra.gmra.mrb[0].mxu1 %vm267_vm2, %v266_v52 }
 0x340   :  { %v1383_v61 = vpop.f32.mrb[0].mxu1 }
 0x341   :  { %v351_v62 = vsel %vm1725_vm3, %v1383_v61, -1e+30  ;;  %v341_v63 = vpop.f32.mrb[1].mxu1 }
 0x342   :  { %v350_v1 = vsel %vm1729_vm4, %v341_v63, -1e+30  ;;  %v356_v2 = vsel %vm352_vm5, %v351_v62, -inf }
 0x343   :  { %357 = vmax.xlane.f32.xlu0 %v356_v2  ;;  %v353_v3 = vsel %vm352_vm5, %v350_v1, -inf }
 0x344   :  { %354 = vmax.xlane.f32.xlu1 %v353_v3  ;;  %v1458_v3 = vld [vmem:[%s1978_s8] ss:$16 sps:$4 sm:$0xff]  }
 0x355   :  { %463 = vrot.lane.b32.xlu1 %v1716_v50, %s1577_s1 }
 0x359   :  { %375 = vrot.lane.b32.xlu0 %v1716_v50, %s1578_s3 }
 0x35d   :  { %461 = vrot.lane.b32.xlu0 %v266_v52, %s1578_s3  ;;  %v1452_v52 = vld [vmem:[%s1976_s6 + $0x10] sm:$0xff]  }
 0x3d0   :  { %v358_v4 = vpop.xlane.xlu0 %357 }
 0x3d1   :  { %v360_v5 = vsub.f32 %v351_v62, %v358_v4  ;;  %v355_v6 = vpop.xlane.xlu1 %354  ;;  %v1460_v4 = vld [vmem:[%s1978_s8 + $0x4] ss:$16 sps:$4 sm:$0xff]  }
 0x3d2   :  { %v359_v7 = vsub.f32 %v350_v1, %v355_v6  ;;  %v1463_v6 = vld [vmem:[%s1978_s8 + $0xc] ss:$16 sps:$4 sm:$0xff]   ;;  %981 = vmatprep.subr.bf16.mxu0 %v1460_v4 }
 0x3d3   :  { %v363_v8 = vmul.f32 1.442695, %v360_v5  ;;  %v1461_v5 = vld [vmem:[%s1978_s8 + $0x8] ss:$16 sps:$4 sm:$0xff]   ;;  %982 = vmatpush1.bf16.msra.mxu0 %v1458_v3 }
 0x3d4   :  { %v361_v9 = vmul.f32 1.442695, %v359_v7  ;;  %v376_v10 = vpop.permute.xlu0 %375  ;;  %v1469_v7 = vld [vmem:[%s1978_s8 + $0x2c] ss:$16 sps:$4 sm:$0xff]  }
 0x3d5   :  { %1524 = vpow2.f32 %v363_v8  ;;  %1384 = vmatprep.subr.mxu1 %v376_v10  ;;  %v464_v11 = vpop.permute.xlu1 %463  ;;  %v1464_v8 = vld [vmem:[%s1978_s8 + $0x20] ss:$16 sps:$4 sm:$0xff]  }
 0x3d6   :  { %1385 = vmatpush3.msra.mxu1 %v376_v10  ;;  %1526 = vpow2.f32 %v361_v9  ;;  %v1467_v9 = vld [vmem:[%s1978_s8 + $0x28] ss:$16 sps:$4 sm:$0xff]   ;;  %v1472_v10 = vld [vmem:[%s1978_s8 + $0x44] ss:$16 sps:$4 sm:$0xff]  }
 0x3d7   :  { %1389 = vmatprep.subr.msk.mxu1 %vm267_vm2, %v464_v11 }
 0x3d8   :  { %v462_v24 = vpop.permute.xlu0 %461 }
 0x3df   :  { %v1525_v12 = vpop.eup %1524 }
 0x3e0   :  { %v368_v13 = vsel %vm352_vm5, %v1525_v12, 0.0  ;;  %v1527_v14 = vpop.eup %1526 }
 0x3e1   :  { %369 = vadd.xlane.f32.xlu1 %v368_v13  ;;  %v365_v15 = vsel %vm352_vm5, %v1527_v14, 0.0  ;;  %v1473_v13 = vld [vmem:[%s1978_s8 + $0x48] ss:$16 sps:$4 sm:$0xff]  }
 0x3e5   :  { %366 = vadd.xlane.f32.xlu1 %v365_v15  ;;  %v1481_v15 = vld [vmem:[%s1978_s8 + $0x6c] ss:$16 sps:$4 sm:$0xff]  }
 0x3f6   :  { %459 = vrot.lane.b32.xlu1 %v231_v51, %s1578_s3  ;;  %v1451_v51 = vld [vmem:[%s1976_s6 + $0x8] sm:$0xff]  }
 0x46e   :  { %v370_v16 = vpop.xlane.xlu1 %369 }
 0x46f   :  { %1528 = vrcp.f32 %v370_v16  ;;  %v1476_v16 = vld [vmem:[%s1978_s8 + $0x60] ss:$16 sps:$4 sm:$0xff]  }
 0x472   :  { %v367_v18 = vpop.xlane.xlu1 %366 }
 0x473   :  { %1530 = vrcp.f32 %v367_v18  ;;  %v1479_v18 = vld [vmem:[%s1978_s8 + $0x68] ss:$16 sps:$4 sm:$0xff]  }
 0x476   :  { %v460_v23 = vpop.permute.xlu1 %459 }
 0x479   :  { %v1529_v19 = vpop.eup %1528 }
 0x47a   :  { %v374_v22 = vmul.f32 %v1529_v19, %v1525_v12  ;;  %v1470_v12 = vld [vmem:[%s1978_s8 + $0x40] ss:$16 sps:$4 sm:$0xff]  }
 0x47d   :  { %v1531_v20 = vpop.eup %1530 }
 0x47e   :  { %v373_v21 = vmul.f32 %v1531_v20, %v1527_v14  ;;  %v1478_v14 = vld [vmem:[%s1978_s8 + $0x64] ss:$16 sps:$4 sm:$0xff]  }
 0x480   :  { %1386 = vmatprep.mubr.msk.f32.mxu1 %vm352_vm5, %v373_v21 }
 0x481   :  { %1387 = vmatmul.mubr.msk.f32.vlgmr.msra.gmra.mrb[2].mxu1 %vm352_vm5, %v374_v22 }
 0x482   :  { %1390 = vmatpush3.xpose.msk.msra.mxu1 %vm267_vm2, %v464_v11  ;;  %1391 = vmatprep.mubr.msk.f32.mxu1 %vm267_vm2, %v460_v23  ;;  %v1475_v11 = vld [vmem:[%s1978_s8 + $0x4c] ss:$16 sps:$4 sm:$0xff]   ;;  %v1484_v23 = vld [vmem:[%s1978_s8 + $0x84] ss:$16 sps:$4 sm:$0xff]  }
 0x485   :  { %1392 = vmatmul.mubr.msk.f32.vlgmr.msra.gmra.mrb[4].mxu1 %vm267_vm2, %v462_v24  ;;  %v1487_v24 = vld [vmem:[%s1978_s8 + $0x8c] ss:$16 sps:$4 sm:$0xff]  }
 0x554   :  { %v1388_v25 = vpop.f32.mrb[2].mxu1 }
 0x555   :  { %v1753_v26 = vpop.f32.mrb[3].mxu1 }
 0x558   :  { %v1393_v27 = vpop.f32.mrb[4].mxu1 }
 0x559   :  { %v547_v28 = vsel %vm1725_vm3, %v1393_v27, -1e+30  ;;  %v537_v29 = vpop.f32.mrb[5].mxu1  ;;  %v1488_v27 = vld [vmem:[%s1978_s8 + $0xa0] ss:$16 sps:$4 sm:$0xff]  }
 0x55a   :  { %v546_v30 = vsel %vm1729_vm4, %v537_v29, -1e+30  ;;  %v551_v31 = vsel %vm352_vm5, %v547_v28, -inf  ;;  %v1493_v29 = vld [vmem:[%s1978_s8 + $0xac] ss:$16 sps:$4 sm:$0xff]  }
 0x55b   :  { %552 = vmax.xlane.f32.xlu0 %v551_v31  ;;  %v548_v32 = vsel %vm352_vm5, %v546_v30, -inf  ;;  %v1499_v31 = vld [vmem:[%s1978_s8 + $0xcc] ss:$16 sps:$4 sm:$0xff]  }
 0x55c   :  { %549 = vmax.xlane.f32.xlu1 %v548_v32  ;;  %v1494_v32 = vld [vmem:[%s1978_s8 + $0xc0] ss:$16 sps:$4 sm:$0xff]  }
 0x5e8   :  { %v553_v33 = vpop.xlane.xlu0 %552 }
 0x5e9   :  { %v555_v34 = vsub.f32 %v547_v28, %v553_v33  ;;  %v550_v35 = vpop.xlane.xlu1 %549  ;;  %v1491_v28 = vld [vmem:[%s1978_s8 + $0xa8] ss:$16 sps:$4 sm:$0xff]  }
 0x5ea   :  { %v554_v36 = vsub.f32 %v546_v30, %v550_v35  ;;  %v1496_v30 = vld [vmem:[%s1978_s8 + $0xc4] ss:$16 sps:$4 sm:$0xff]   ;;  %v1497_v33 = vld [vmem:[%s1978_s8 + $0xc8] ss:$16 sps:$4 sm:$0xff]   ;;  %v1505_v35 = vld [vmem:[%s1978_s8 + $0xec] ss:$16 sps:$4 sm:$0xff]  }
 0x5eb   :  { %v558_v37 = vmul.f32 1.442695, %v555_v34  ;;  %v1502_v34 = vld [vmem:[%s1978_s8 + $0xe4] ss:$16 sps:$4 sm:$0xff]  }
 0x5ec   :  { %v556_v38 = vmul.f32 1.442695, %v554_v36  ;;  %v1500_v36 = vld [vmem:[%s1978_s8 + $0xe0] ss:$16 sps:$4 sm:$0xff]  }
 0x5ed   :  { %1532 = vpow2.f32 %v558_v37  ;;  %v1503_v37 = vld [vmem:[%s1978_s8 + $0xe8] ss:$16 sps:$4 sm:$0xff]  }
 0x5ee   :  { %1534 = vpow2.f32 %v556_v38 }
 0x5f7   :  { %v1533_v39 = vpop.eup %1532 }
 0x5f8   :  { %v1535_v40 = vpop.eup %1534  ;;  %v563_v41 = vsel %vm352_vm5, %v1533_v39, 0.0 }
 0x5f9   :  { %564 = vadd.xlane.f32.xlu1 %v563_v41  ;;  %v560_v42 = vsel %vm352_vm5, %v1535_v40, 0.0 }
 0x5fa   :  { %561 = vadd.xlane.f32.xlu0 %v560_v42  ;;  %v1290_v42 = vld [vmem:[%s1977_s7] ss:$0 sm:$0xff] }
 0x60a   :  { %655 = vrot.lane.b32.xlu1 %v1388_v25, %s1579_s18  ;;  %v1482_v25 = vld [vmem:[%s1978_s8 + $0x80] ss:$16 sps:$4 sm:$0xff]  }
 0x610   :  { %570 = vrot.lane.b32.xlu0 %v1716_v50, %s1579_s18  ;;  %v1450_v50 = vld [vmem:[%s1976_s6] sm:$0xff]  }
 0x686   :  { %v565_v43 = vpop.xlane.xlu1 %564 }
 0x687   :  { %1536 = vrcp.f32 %v565_v43  ;;  %v562_v44 = vpop.xlane.xlu0 %561 }
 0x688   :  { %1538 = vrcp.f32 %v562_v44 }
 0x68a   :  { %v656_v60 = vpop.permute.xlu1 %655 }
 0x68b   :  { %v571_v45 = vpop.permute.xlu0 %570  ;;  %v666_v61 = vsel %vm267_vm2, %v1753_v26, %v656_v60  ;;  %v1490_v26 = vld [vmem:[%s1978_s8 + $0xa4] ss:$16 sps:$4 sm:$0xff]   ;;  %v1521_v60 = vld [vmem:[%s1979_s9 + $0x38] sm:$0xff]  }
 0x68c   :  { %1394 = vmatprep.subr.mxu1 %v571_v45 }
 0x68d   :  { %1395 = vmatpush3.msra.mxu1 %v571_v45  ;;  %v1506_v45 = vld [vmem:[%s1979_s9 + $0x40] sm:$0xff]  }
 0x68e   :  { %1399 = vmatprep.subr.bf16.mxu1 %v1574_v17 }
 0x691   :  { %v1537_v46 = vpop.eup %1536 }
 0x692   :  { %v1539_v47 = vpop.eup %1538  ;;  %v569_v49 = vmul.f32 %v1537_v46, %v1533_v39  ;;  %v1507_v46 = vld [vmem:[%s1979_s9] sm:$0xff]  }
 0x693   :  { %v568_v48 = vmul.f32 %v1539_v47, %v1535_v40  ;;  %v1508_v47 = vld [vmem:[%s1979_s9 + $0x48] sm:$0xff]  }
 0x695   :  { %1396 = vmatprep.mubr.msk.f32.mxu1 %vm352_vm5, %v568_v48  ;;  %v1509_v48 = vld [vmem:[%s1979_s9 + $0x8] sm:$0xff]  }
 0x696   :  { %1397 = vmatmul.mubr.msk.f32.vlgmr.msra.gmra.mrb[6].mxu1 %vm352_vm5, %v569_v49  ;;  %v1510_v49 = vld [vmem:[%s1979_s9 + $0x50] sm:$0xff]  }
 0x697   :  { %1400 = vmatpush3.bf16.msra.mxu1 %v1450_v50  ;;  %1415 = vmatprep.mubr.msk.f32.mxu1 %vm1580_vm6, %v1574_v17  ;;  %v1511_v50 = vld [vmem:[%s1979_s9 + $0x10] sm:$0xff]  }
 0x698   :  { %1401 = vmatprep.subr.bf16.mxu1 %v1574_v17 }
 0x69b   :  { %1402 = vmatpush3.bf16.msra.mxu1 %v1451_v51  ;;  %v1512_v51 = vld [vmem:[%s1979_s9 + $0x58] sm:$0xff]  }
 0x69c   :  { %1403 = vmatprep.subr.bf16.mxu1 %v1574_v17 }
 0x69f   :  { %1404 = vmatpush3.bf16.msra.mxu1 %v1452_v52  ;;  %v1513_v52 = vld [vmem:[%s1979_s9 + $0x18] sm:$0xff]  }
 0x6a0   :  { %1405 = vmatprep.subr.bf16.mxu1 %v1574_v17 }
 0x6a3   :  { %1406 = vmatpush3.bf16.msra.mxu1 %v1453_v53  ;;  %v1514_v53 = vld [vmem:[%s1979_s9 + $0x60] sm:$0xff]  }
 0x6a4   :  { %1407 = vmatprep.subr.bf16.mxu1 %v1574_v17 }
 0x6a7   :  { %1408 = vmatpush3.bf16.msra.mxu1 %v1454_v54  ;;  %v1515_v54 = vld [vmem:[%s1979_s9 + $0x20] sm:$0xff]  }
 0x6a8   :  { %1409 = vmatprep.subr.bf16.mxu1 %v1574_v17 }
 0x6ab   :  { %1410 = vmatpush3.bf16.msra.mxu1 %v1455_v55  ;;  %v1516_v55 = vld [vmem:[%s1979_s9 + $0x68] sm:$0xff]  }
 0x6ac   :  { %1411 = vmatprep.subr.bf16.mxu1 %v1574_v17 }
 0x6af   :  { %1412 = vmatpush3.bf16.msra.mxu1 %v1456_v56  ;;  %v1517_v56 = vld [vmem:[%s1979_s9 + $0x28] sm:$0xff]  }
 0x6b0   :  { %1413 = vmatprep.subr.bf16.mxu1 %v1574_v17 }
 0x6b3   :  { %1414 = vmatpush3.bf16.msra.mxu1 %v1457_v57  ;;  %v1518_v57 = vld [vmem:[%s1979_s9 + $0x70] sm:$0xff]  }
 0x6b4   :  { %1020 = vmatprep.subr.bf16.mxu1 %v1463_v6 }
 0x769   :  { %v1398_v58 = vpop.f32.mrb[6].mxu1 }
 0x76a   :  { %663 = vrot.lane.b32.xlu0 %v1398_v58, %s1577_s1  ;;  %v645_v59 = vpop.f32.mrb[7].mxu1  ;;  %v1519_v58 = vld [vmem:[%s1979_s9 + $0x30] sm:$0xff]  }
 0x76b   :  { %659 = vrot.lane.b32.xlu1 %v645_v59, %s1578_s3  ;;  %v1520_v59 = vld [vmem:[%s1979_s9 + $0x78] sm:$0xff]   ;;  %s1581_s9 = smov [#allocation2]  }
 0x76c   :  { %s1247_s21 = sshll.u32 %s1581_s9, 4  ;;  %s1248_s21 = int_to_ptr.vmem [resolvable:$true] %s1247_s21 }
 0x76d   :  { %s1550_s22 = scalar_lea.vmem %s1248_s21, 128  ;;  %p1555_p1 = scmp.lt.s32.totalorder %s1248_s21, %s1248_s21 }
 0x76e   :  { %p1551_p0 = scmp.ne.s32.totalorder %s1248_s21, %s1550_s22  ;;  %p1556_p2 = scmp.lt.s32.totalorder %s1550_s22, %s1550_s22 }
 0x770   :  { %p1557_p3 = por %p1556_p2, %p1555_p1 }
 0x772   :  { %p1558_p4 = pnand %p1557_p3, %p1551_p0 }
 0x7dc   :  { %v664_v63 = vpop.permute.xlu0 %663 }
 0x7dd   :  { %v660_v62 = vpop.permute.xlu1 %659 }
 0x7de   :  { %v668_v1 = vsel %vm667_vm7, %v666_v61, %v660_v62 }
 0x7df   :  { %v670_v2 = vsel %vm669_vm8, %v668_v1, %v664_v63 }
 0x7e0   :  { %1416 = vmatmul.mubr.f32.vlgmr.msra.gmra.mrb[8].mxu1 %v670_v2 }
 0x7e1   :  { %1052 = vmatprep.mubr.f32.mxu1 %v1574_v17  ;;  %v1466_v17 = vld [vmem:[%s1978_s8 + $0x24] ss:$16 sps:$4 sm:$0xff]   ;;  %1021 = vmatpush1.bf16.msra.mxu1 %v1461_v5 }
 0x7e2   :  { %983 = vmatprep.subr.bf16.mxu0 %v1466_v17  ;;  %1022 = vmatprep.subr.bf16.mxu1 %v1469_v7 }
 0x7e3   :  { %984 = vmatpush1.bf16.msra.mxu0 %v1464_v8 }
 0x7e4   :  { %985 = vmatprep.subr.bf16.mxu0 %v1472_v10 }
 0x7e5   :  { %1023 = vmatpush1.bf16.msra.mxu1 %v1467_v9 }
 0x7e6   :  { %1024 = vmatprep.subr.bf16.mxu1 %v1475_v11 }
 0x7e7   :  { %986 = vmatpush1.bf16.msra.mxu0 %v1470_v12 }
 0x7e8   :  { %987 = vmatprep.subr.bf16.mxu0 %v1478_v14 }
 0x7e9   :  { %1025 = vmatpush1.bf16.msra.mxu1 %v1473_v13 }
 0x7ea   :  { %1026 = vmatprep.subr.bf16.mxu1 %v1481_v15 }
 0x7eb   :  { %988 = vmatpush1.bf16.msra.mxu0 %v1476_v16 }
 0x7ec   :  { %989 = vmatprep.subr.bf16.mxu0 %v1484_v23 }
 0x7ed   :  { %1027 = vmatpush1.bf16.msra.mxu1 %v1479_v18 }
 0x7ee   :  { %1028 = vmatprep.subr.bf16.mxu1 %v1487_v24 }
 0x7ef   :  { %990 = vmatpush1.bf16.msra.mxu0 %v1482_v25 }
 0x7f0   :  { %991 = vmatprep.subr.bf16.mxu0 %v1490_v26 }
 0x7f3   :  { %992 = vmatpush1.bf16.msra.mxu0 %v1488_v27 }
 0x7f4   :  { %993 = vmatprep.subr.bf16.mxu0 %v1496_v30 }
 0x7f7   :  { %994 = vmatpush1.bf16.msra.mxu0 %v1494_v32 }
 0x7f8   :  { %995 = vmatprep.subr.bf16.mxu0 %v1502_v34 }
 0x7fb   :  { %996 = vmatpush1.bf16.msra.mxu0 %v1500_v36 }
 0x7fc   :  { %1360 = vmatprep.subr.bf16.mxu0 %v1506_v45 }
 0x8b3   :  { %v769_v19 = vpop.f32.mrb[8].mxu1 }
 0x8b4   :  { %v1853_v20 = vadd.f32 %v769_v19, %v1640_v0  ;;  %v1417_v21 = vpop.f32.mrb[9].mxu1  ;;  %v1485_v0 = vld [vmem:[%s1978_s8 + $0x88] ss:$16 sps:$4 sm:$0xff]  }
 0x8b5   :  { %1029 = vmatpush1.bf16.msra.mxu1 %v1485_v0 }
 0x8b6   :  { %v775_v22 = vmul.f32 %v1853_v20, %v1853_v20  ;;  %1030 = vmatprep.subr.bf16.mxu1 %v1493_v29 }
 0x8b8   :  { %776 = vadd.xlane.f32.xlu1 %v775_v22 }
 0x8b9   :  { %1031 = vmatpush1.bf16.msra.mxu1 %v1491_v28 }
 0x8ba   :  { %1032 = vmatprep.subr.bf16.mxu1 %v1499_v31 }
 0x8bd   :  { %1033 = vmatpush1.bf16.msra.mxu1 %v1497_v33 }
 0x8be   :  { %1034 = vmatprep.subr.bf16.mxu1 %v1505_v35 }
 0x8c1   :  { %1035 = vmatpush1.bf16.msra.mxu1 %v1503_v37 }
 0x945   :  { %v777_v38 = vpop.xlane.xlu1 %776 }
 0x946   :  { %v778_v39 = vmul.f32 0.0078125, %v777_v38 }
 0x948   :  { %v779_v40 = vadd.f32 1e-06, %v778_v39 }
 0x94a   :  { %1540 = vrsqrt.f32 %v779_v40 }
 0x954   :  { %v1541_v41 = vpop.eup %1540 }
 0x955   :  { %v781_v43 = vmul.f32 %v1541_v41, %v1853_v20 }
 0x957   :  { %v788_v44 = vmul.f32 %v1290_v42, %v781_v43 }
 0x959   :  { %1014 = vmatmul.mubr.f32.vlgmr.msra.gmra.mrb[2].mxu0 %v788_v44  ;;  %1053 = vmatmul.mubr.f32.vlgmr.msra.gmra.mrb[10].mxu1 %v788_v44 }
 0x95a   :  { %1361 = vmatpush3.bf16.msra.mxu0 %v1507_v46 }
 0x95b   :  { %1362 = vmatprep.subr.bf16.mxu0 %v1508_v47 }
 0x95e   :  { %1363 = vmatpush3.bf16.msra.mxu0 %v1509_v48 }
 0x95f   :  { %1364 = vmatprep.subr.bf16.mxu0 %v1510_v49 }
 0x962   :  { %1365 = vmatpush3.bf16.msra.mxu0 %v1511_v50 }
 0x963   :  { %1366 = vmatprep.subr.bf16.mxu0 %v1512_v51 }
 0x966   :  { %1367 = vmatpush3.bf16.msra.mxu0 %v1513_v52 }
 0x967   :  { %1368 = vmatprep.subr.bf16.mxu0 %v1514_v53 }
 0x96a   :  { %1369 = vmatpush3.bf16.msra.mxu0 %v1515_v54 }
 0x96b   :  { %1370 = vmatprep.subr.bf16.mxu0 %v1516_v55 }
 0x96e   :  { %1371 = vmatpush3.bf16.msra.mxu0 %v1517_v56 }
 0x96f   :  { %1372 = vmatprep.subr.bf16.mxu0 %v1518_v57 }
 0x972   :  { %1373 = vmatpush3.bf16.msra.mxu0 %v1519_v58 }
 0x973   :  { %1374 = vmatprep.subr.bf16.mxu0 %v1520_v59 }
 0x976   :  { %1375 = vmatpush3.bf16.msra.mxu0 %v1521_v60 }
 0xa2c   :  { %v1015_v61 = vpop.f32.mrb[2].mxu0  ;;  %v1054_v62 = vpop.f32.mrb[10].mxu1 }
 0xa2d   :  { %v1059_v63 = vsub.f32 0.0, %v1015_v61  ;;  %v1017_v1 = vpop.f32.mrb[3].mxu0  ;;  %v1056_v2 = vpop.f32.mrb[11].mxu1 }
 0xa2e   :  { %v1060_v3 = vsub.f32 0.0, %v1017_v1 }
 0xa2f   :  { %v1061_v4 = vmul.f32 1.442695, %v1059_v63 }
 0xa30   :  { %v1063_v5 = vmul.f32 1.442695, %v1060_v3 }
 0xa31   :  { %1542 = vpow2.f32 %v1061_v4 }
 0xa32   :  { %1544 = vpow2.f32 %v1063_v5 }
 0xa3b   :  { %v1543_v6 = vpop.eup %1542 }
 0xa3c   :  { %v1545_v17 = vpop.eup %1544  ;;  %v1065_v7 = vadd.f32 1.0, %v1543_v6 }
 0xa3d   :  { %v1066_v8 = vadd.f32 1.0, %v1545_v17 }
 0xa3e   :  { %1546 = vrcp.f32 %v1065_v7 }
 0xa3f   :  { %1548 = vrcp.f32 %v1066_v8 }
 0xa48   :  { %v1547_v9 = vpop.eup %1546 }
 0xa49   :  { %v1549_v10 = vpop.eup %1548  ;;  %v1069_v11 = vmul.f32 %v1547_v9, %v1015_v61 }
 0xa4a   :  { %v1070_v12 = vmul.f32 %v1549_v10, %v1017_v1 }
 0xa4b   :  { %v1071_v13 = vmul.f32 %v1069_v11, %v1054_v62 }
 0xa4c   :  { %v1072_v14 = vmul.f32 %v1070_v12, %v1056_v2 }
 0xa4e   :  { %1233 = vmatprep.mubr.f32.mxu0 %v1072_v14 }
 0xa4f   :  { %1234 = vmatmul.mubr.f32.vlgmr.msra.gmra.mrb[4].mxu0 %v1071_v13 }
 0xb22   :  { %v1376_v15 = vpop.f32.mrb[4].mxu0 }
 0xb23   :  { %v1377_v16 = vpop.f32.mrb[5].mxu0 }
 0xb24   :  { %v1378_v18 = vadd.f32 %v1377_v16, %v1376_v15 }
 0xb26   :  { %v1239_v19 = vadd.f32 %v1378_v18, %v1853_v20 }
 0xb28   :  { %1240 = vst [vmem:[#allocation2] sm:$0xff] %v1239_v19 }
 0xb29   :  { %1561 = shalt.err (!%p1558_p4)
}
 0xb2a   :  { %s1562_s24 = scalar_lea.hbm %s1980_s10, 128 }
 0xb2b   :  { %p1563_p5 = scmp.ne.s32.totalorder %s1980_s10, %s1562_s24  ;;  %p1566_p6 = scmp.lt.u32.totalorder %s1562_s24, %s1980_s10 }
 0xb2d   :  { %p1568_p7 = pnand %p1566_p6, %p1563_p5 }
 0xb2f   :  { %1571 = shalt.err (!%p1568_p7)
}
 0xb30   :  { %1250 = dma.vmem_to_hbm [thread:$0]  %s1248_s21, 128, %s1980_s10, [#allocation3]  }
 0xb31   :  { %1572 = dma.done.wait [#allocation3], 128  }
 0xb32   :  { %1573 = vsyncadd [#allocation3], 4294967168 }
 0xb33   :  { %1254 = vsyncpa [#allocation3], 1 }

</bundles_post_ra>
